<compile_context>
chip_gen: v5e
topology: v5e:2x2
jax: 0.10.0
libtpu: 0.0.40
codegen_flags: <defaults>
</compile_context>

<pallas_src>
import jax
import jax.numpy as jnp
from jax.experimental import pallas as pl
from jax.experimental.pallas import tpu as pltpu

LANE = 128
SUBLANE = 8


def _round_up(n, m):
    return (n + m - 1) // m * m


def decoder_kernel(x_ref, w1_ref, b1_ref, w2_ref, b2_ref, w3_ref, b3_ref, o_ref):
    # x: (TILE_B, latent) f32; w1/b* f32; w2/w3 bf16; output bf16.
    x = x_ref[...].astype(jnp.float32)
    latent = x.shape[1]

    # ---- Layer 1: K == latent (tiny). VPU outer-product instead of a padded MXU pass.
    h1 = x[:, 0:1] * w1_ref[0:1, :]
    for j in range(1, latent):
        h1 = h1 + x[:, j:j + 1] * w1_ref[j:j + 1, :]
    # Bias add + ReLU in f32, single cast to bf16 (v5e has no bf16 VPU).
    h1 = jnp.maximum(h1 + b1_ref[...], 0.0).astype(jnp.bfloat16)

    # ---- Layer 2: bf16 MXU matmul, f32 accumulation; ReLU in f32, carry bf16.
    h2 = jnp.dot(h1, w2_ref[...], preferred_element_type=jnp.float32) + b2_ref[...]
    h2 = jnp.maximum(h2, 0.0).astype(jnp.bfloat16)

    # ---- Layer 3: bf16 MXU matmul, f32 accumulation; sigmoid via a single tanh (EUP).
    logits = jnp.dot(h2, w3_ref[...], preferred_element_type=jnp.float32) + b3_ref[...]
    o_ref[...] = (0.5 * jnp.tanh(0.5 * logits) + 0.5).astype(o_ref.dtype)


def decoder_forward(x, padded_params, *, tile_b=1024, out_dtype=jnp.bfloat16):
    """Run the fused decoder. `padded_params` comes from pad_decoder_params().

    tile_b=1024 fits comfortably in scoped VMEM on every generation (the explicit
    vmem_limit below covers v5e's 16 MiB default); raise toward 2048 on v6e/v7x for
    fewer grid steps if desired.
    """
    w1, b1, w2, b2, w3, b3 = padded_params
    B, latent = x.shape
    H1P, H2P, D = w1.shape[1], w2.shape[1], w3.shape[1]

    # Near-equal 8-aligned batch chunks: never pad by a whole extra tile.
    n_steps = max(1, (B + tile_b - 1) // tile_b)
    tile_b = _round_up((B + n_steps - 1) // n_steps, SUBLANE)
    B_pad = n_steps * tile_b
    if B_pad != B:
        x = jnp.pad(x, ((0, B_pad - B), (0, 0)))

    const = lambda i: (0, 0)  # weights/biases: same block every step -> VMEM-resident

    # Explicit scoped-VMEM budget: double-buffered x/out blocks + (double-buffered)
    # resident weights + f32/bf16 activation temporaries, with headroom.
    weight_bytes = sum(int(a.size) * a.dtype.itemsize for a in padded_params)
    io_bytes = tile_b * (latent * 4 + D * jnp.dtype(out_dtype).itemsize)
    temp_bytes = tile_b * (H1P * (4 + 2) + H2P * (4 + 2) + D * 4)
    vmem_limit = int(min(48 << 20,
                         max(32 << 20,
                             2 * io_bytes + 2 * weight_bytes + 2 * temp_bytes)))

    out = pl.pallas_call(
        decoder_kernel,
        out_shape=jax.ShapeDtypeStruct((B_pad, D), out_dtype),
        grid_spec=pltpu.PrefetchScalarGridSpec(
            num_scalar_prefetch=0,
            grid=(n_steps,),
            in_specs=[
                pl.BlockSpec((tile_b, latent), lambda i: (i, 0)),  # x (pipelined)
                pl.BlockSpec((latent, H1P), const),                # w1 (f32, tiny)
                pl.BlockSpec((1, H1P), const),                     # b1
                pl.BlockSpec((H1P, H2P), const),                   # w2 (bf16)
                pl.BlockSpec((1, H2P), const),                     # b2
                pl.BlockSpec((H2P, D), const),                     # w3 (bf16)
                pl.BlockSpec((1, D), const),                       # b3
            ],
            out_specs=pl.BlockSpec((tile_b, D), lambda i: (i, 0)),
        ),
        compiler_params=pltpu.CompilerParams(
            dimension_semantics=("parallel",),
            vmem_limit_bytes=vmem_limit,
        ),
    )(x, w1, b1, w2, b2, w3, b3)

    # No column slicing needed (kernel writes the true 784-wide output); only drop
    # batch padding if any was added.
    return out if B_pad == B else out[:B]


def init_decoder_params(key, latent_size=2, data_size=784):
    """Deterministic init mimicking PyTorch's Linear default (uniform +-1/sqrt(fan_in))."""
    h1 = data_size // 16   # 49
    h2 = data_size // 4    # 196

    def linear(key, fan_in, fan_out):
        kw, kb = jax.random.split(key)
        bound = 1.0 / jnp.sqrt(fan_in)
        w = jax.random.uniform(kw, (fan_in, fan_out), jnp.float32, -bound, bound)
        b = jax.random.uniform(kb, (1, fan_out), jnp.float32, -bound, bound)
        return w, b

    k1, k2, k3 = jax.random.split(key, 3)
    w1, b1 = linear(k1, latent_size, h1)
    w2, b2 = linear(k2, h1, h2)
    w3, b3 = linear(k3, h2, data_size)
    return (w1, b1, w2, b2, w3, b3)


def pad_decoder_params(params):
    """Zero-pad HIDDEN feature dims to lane (128) multiples; cast big weights to bf16.

    Padded bias entries / weight rows / cols are zero, so the extra hidden units
    contribute exactly 0 through ReLU. The OUTPUT feature dim is left at its true
    size (784): the kernel's output block spans the full last dim, so no padded
    columns are ever written back to HBM and no post-kernel slice is needed.
    """
    w1, b1, w2, b2, w3, b3 = params
    latent, h1 = w1.shape
    h2, d = w2.shape[1], w3.shape[1]
    h1p, h2p = _round_up(h1, LANE), _round_up(h2, LANE)

    def padw(w, rows, cols):
        return jnp.pad(w, ((0, rows - w.shape[0]), (0, cols - w.shape[1])))

    def padb(b, cols):
        return jnp.pad(b, ((0, 0), (0, cols - b.shape[1])))

    w1p = padw(w1, latent, h1p)                       # f32 (tiny; feeds VPU outer product)
    w2p = padw(w2, h1p, h2p).astype(jnp.bfloat16)
    w3p = padw(w3, h2p, d).astype(jnp.bfloat16)       # rows padded, cols stay at d=784
    b1p, b2p = padb(b1, h1p), padb(b2, h2p)           # biases stay f32
    return (w1p, b1p, w2p, b2p, w3p, b3)


def decoder_ref(x, params):
    """Pure-JAX f32 reference for correctness checking."""
    w1, b1, w2, b2, w3, b3 = params
    h1 = jax.nn.relu(x @ w1 + b1)
    h2 = jax.nn.relu(h1 @ w2 + b2)
    return jax.nn.sigmoid(h2 @ w3 + b3)


if __name__ == "__main__":
    key = jax.random.PRNGKey(0)
    k_params, k_x = jax.random.split(key)

    latent_size, data_size, batch = 2, 784, 8
    raw_params = init_decoder_params(k_params, latent_size, data_size)
    padded_params = pad_decoder_params(raw_params)
    x = jax.random.normal(k_x, (batch, latent_size), jnp.float32)

    out = decoder_forward(x, padded_params)
    out = jax.block_until_ready(out)

    ref = decoder_ref(x, raw_params)
    assert out.shape == (batch, data_size), out.shape
    # bf16 weights/activations/output (f32 accumulation) -> relaxed tolerance vs f32 ref.
    max_err = float(jnp.max(jnp.abs(out.astype(jnp.float32) - ref)))
    assert max_err < 3e-2, f"mismatch vs reference, max abs err={max_err}"

    print("KERNEL_OK")
</pallas_src>

<mosaic_0001>
module attributes {stable_mosaic.version = 11 : i64} {
  func.func @decoder_kernel(%arg0: i32, %arg1: memref<8x2xf32, #tpu.memory_space<vmem>>, %arg2: memref<2x128xf32, #tpu.memory_space<vmem>>, %arg3: memref<1x128xf32, #tpu.memory_space<vmem>>, %arg4: memref<128x256xbf16, #tpu.memory_space<vmem>>, %arg5: memref<1x256xf32, #tpu.memory_space<vmem>>, %arg6: memref<256x784xbf16, #tpu.memory_space<vmem>>, %arg7: memref<1x784xf32, #tpu.memory_space<vmem>>, %arg8: memref<8x784xbf16, #tpu.memory_space<vmem>>) attributes {dimension_semantics = [#tpu.dimension_semantics<parallel>], iteration_bounds = array<i64: 1>, scalar_prefetch = 0 : i64, scratch_operands = 0 : i64, tpu.core_type = #tpu.core_type<tc>, window_params = [{transform_indices = @transform_0, window_bounds = array<i64: 8, 2>}, {pipeline_mode = #tpu.pipeline_mode<synchronous>, transform_indices = @transform_1, window_bounds = array<i64: 2, 128>}, {pipeline_mode = #tpu.pipeline_mode<synchronous>, transform_indices = @transform_2, window_bounds = array<i64: 1, 128>}, {pipeline_mode = #tpu.pipeline_mode<synchronous>, transform_indices = @transform_3, window_bounds = array<i64: 128, 256>}, {pipeline_mode = #tpu.pipeline_mode<synchronous>, transform_indices = @transform_4, window_bounds = array<i64: 1, 256>}, {pipeline_mode = #tpu.pipeline_mode<synchronous>, transform_indices = @transform_5, window_bounds = array<i64: 256, 784>}, {pipeline_mode = #tpu.pipeline_mode<synchronous>, transform_indices = @transform_6, window_bounds = array<i64: 1, 784>}, {transform_indices = @transform_7, window_bounds = array<i64: 8, 784>}]} {
    %c0 = arith.constant 0 : index
    %c0_0 = arith.constant 0 : index
    %0 = vector.load %arg1[%c0, %c0_0] : memref<8x2xf32, #tpu.memory_space<vmem>>, vector<8x2xf32>
    %1 = vector.extract_strided_slice %0 {offsets = [0, 0], sizes = [8, 1], strides = [1, 1]} : vector<8x2xf32> to vector<8x1xf32>
    %c0_1 = arith.constant 0 : index
    %c0_2 = arith.constant 0 : index
    %2 = vector.load %arg2[%c0_1, %c0_2] : memref<2x128xf32, #tpu.memory_space<vmem>>, vector<1x128xf32>
    %3 = vector.broadcast %1 : vector<8x1xf32> to vector<8x128xf32>
    %4 = vector.broadcast %2 : vector<1x128xf32> to vector<8x128xf32>
    %5 = arith.mulf %3, %4 : vector<8x128xf32>
    %6 = vector.extract_strided_slice %0 {offsets = [0, 1], sizes = [8, 1], strides = [1, 1]} : vector<8x2xf32> to vector<8x1xf32>
    %c1 = arith.constant 1 : index
    %c0_3 = arith.constant 0 : index
    %7 = vector.load %arg2[%c1, %c0_3] : memref<2x128xf32, #tpu.memory_space<vmem>>, vector<1x128xf32>
    %8 = vector.broadcast %6 : vector<8x1xf32> to vector<8x128xf32>
    %9 = vector.broadcast %7 : vector<1x128xf32> to vector<8x128xf32>
    %10 = arith.mulf %8, %9 : vector<8x128xf32>
    %11 = arith.addf %5, %10 : vector<8x128xf32>
    %c0_4 = arith.constant 0 : index
    %c0_5 = arith.constant 0 : index
    %12 = vector.load %arg3[%c0_4, %c0_5] : memref<1x128xf32, #tpu.memory_space<vmem>>, vector<1x128xf32>
    %13 = vector.broadcast %12 : vector<1x128xf32> to vector<8x128xf32>
    %14 = arith.addf %11, %13 : vector<8x128xf32>
    %cst = arith.constant 0.000000e+00 : f32
    %15 = vector.broadcast %cst : f32 to vector<8x128xf32>
    %16 = arith.maximumf %14, %15 : vector<8x128xf32>
    %17 = arith.truncf %16 : vector<8x128xf32> to vector<8x128xbf16>
    %c0_6 = arith.constant 0 : index
    %c0_7 = arith.constant 0 : index
    %18 = vector.load %arg4[%c0_6, %c0_7] : memref<128x256xbf16, #tpu.memory_space<vmem>>, vector<128x256xbf16>
    %cst_8 = arith.constant dense<0.000000e+00> : vector<8x256xf32>
    %19 = tpu.matmul %17, %18, %cst_8 {dimension_numbers = #tpu.dot_dimension_numbers<[1], [0], [0], [1], [0, 0, 1, 1], [], []>} : vector<8x128xbf16>, vector<128x256xbf16>, vector<8x256xf32> -> vector<8x256xf32>
    %c0_9 = arith.constant 0 : index
    %c0_10 = arith.constant 0 : index
    %20 = vector.load %arg5[%c0_9, %c0_10] : memref<1x256xf32, #tpu.memory_space<vmem>>, vector<1x256xf32>
    %21 = vector.broadcast %20 : vector<1x256xf32> to vector<8x256xf32>
    %22 = arith.addf %19, %21 : vector<8x256xf32>
    %cst_11 = arith.constant 0.000000e+00 : f32
    %23 = vector.broadcast %cst_11 : f32 to vector<8x256xf32>
    %24 = arith.maximumf %22, %23 : vector<8x256xf32>
    %25 = arith.truncf %24 : vector<8x256xf32> to vector<8x256xbf16>
    %c0_12 = arith.constant 0 : index
    %c0_13 = arith.constant 0 : index
    %26 = vector.load %arg6[%c0_12, %c0_13] : memref<256x784xbf16, #tpu.memory_space<vmem>>, vector<256x784xbf16>
    %cst_14 = arith.constant dense<0.000000e+00> : vector<8x784xf32>
    %27 = tpu.matmul %25, %26, %cst_14 {dimension_numbers = #tpu.dot_dimension_numbers<[1], [0], [0], [1], [0, 0, 1, 1], [], []>} : vector<8x256xbf16>, vector<256x784xbf16>, vector<8x784xf32> -> vector<8x784xf32>
    %c0_15 = arith.constant 0 : index
    %c0_16 = arith.constant 0 : index
    %28 = vector.load %arg7[%c0_15, %c0_16] : memref<1x784xf32, #tpu.memory_space<vmem>>, vector<1x784xf32>
    %29 = vector.broadcast %28 : vector<1x784xf32> to vector<8x784xf32>
    %30 = arith.addf %27, %29 : vector<8x784xf32>
    %cst_17 = arith.constant 5.000000e-01 : f32
    %31 = vector.broadcast %cst_17 : f32 to vector<8x784xf32>
    %32 = arith.mulf %31, %30 : vector<8x784xf32>
    %33 = math.tanh %32 : vector<8x784xf32>
    %cst_18 = arith.constant 5.000000e-01 : f32
    %34 = vector.broadcast %cst_18 : f32 to vector<8x784xf32>
    %35 = arith.mulf %34, %33 : vector<8x784xf32>
    %cst_19 = arith.constant 5.000000e-01 : f32
    %36 = vector.broadcast %cst_19 : f32 to vector<8x784xf32>
    %37 = arith.addf %35, %36 : vector<8x784xf32>
    %38 = arith.truncf %37 : vector<8x784xf32> to vector<8x784xbf16>
    %c0_20 = arith.constant 0 : index
    %c0_21 = arith.constant 0 : index
    %39 = vector.load %arg8[%c0_20, %c0_21] : memref<8x784xbf16, #tpu.memory_space<vmem>>, vector<8x784xbf16>
    tpu.vector_store %arg8[%c0_20, %c0_21], %38 {strides = array<i32>} : memref<8x784xbf16, #tpu.memory_space<vmem>>, vector<8x784xbf16>,
    return
  }
  func.func @transform_0(%arg0: i32) -> (i32, i32) {
    %c0_i32 = arith.constant 0 : i32
    %c0_i32_0 = arith.constant 0 : i32
    return %arg0, %c0_i32 : i32, i32
  }
  func.func @transform_1(%arg0: i32) -> (i32, i32) {
    %c0_i32 = arith.constant 0 : i32
    %c0_i32_0 = arith.constant 0 : i32
    %c0_i32_1 = arith.constant 0 : i32
    return %c0_i32, %c0_i32_0 : i32, i32
  }
  func.func @transform_2(%arg0: i32) -> (i32, i32) {
    %c0_i32 = arith.constant 0 : i32
    %c0_i32_0 = arith.constant 0 : i32
    %c0_i32_1 = arith.constant 0 : i32
    return %c0_i32, %c0_i32_0 : i32, i32
  }
  func.func @transform_3(%arg0: i32) -> (i32, i32) {
    %c0_i32 = arith.constant 0 : i32
    %c0_i32_0 = arith.constant 0 : i32
    %c0_i32_1 = arith.constant 0 : i32
    return %c0_i32, %c0_i32_0 : i32, i32
  }
  func.func @transform_4(%arg0: i32) -> (i32, i32) {
    %c0_i32 = arith.constant 0 : i32
    %c0_i32_0 = arith.constant 0 : i32
    %c0_i32_1 = arith.constant 0 : i32
    return %c0_i32, %c0_i32_0 : i32, i32
  }
  func.func @transform_5(%arg0: i32) -> (i32, i32) {
    %c0_i32 = arith.constant 0 : i32
    %c0_i32_0 = arith.constant 0 : i32
    %c0_i32_1 = arith.constant 0 : i32
    return %c0_i32, %c0_i32_0 : i32, i32
  }
  func.func @transform_6(%arg0: i32) -> (i32, i32) {
    %c0_i32 = arith.constant 0 : i32
    %c0_i32_0 = arith.constant 0 : i32
    %c0_i32_1 = arith.constant 0 : i32
    return %c0_i32, %c0_i32_0 : i32, i32
  }
  func.func @transform_7(%arg0: i32) -> (i32, i32) {
    %c0_i32 = arith.constant 0 : i32
    %c0_i32_0 = arith.constant 0 : i32
    return %arg0, %c0_i32 : i32, i32
  }
}

</mosaic_0001>

<bundles_post_ra>
// kernel: tpu_custom_call.1
= control target key start
LH: loop header
LB: loop body
LE: loop exit
PB: predicated region body
PF: predicated region fallthrough
CT: control target
= control target key end

     0   :  { %v1826_v2 = vmov 0   ;;  %s2685_s0 = inlined_call_operand.vmem [shape: f32[8,2], index: 0, kind: input, shape index: {}]   ;;  %s2686_s1 = inlined_call_operand.vmem [shape: f32[2,128], index: 1, kind: input, shape index: {}]   ;;  %s2687_s2 = inlined_call_operand.vmem [shape: f32[1,128], index: 2, kind: input, shape index: {}]   ;;  %s2688_s3 = inlined_call_operand.vmem [shape: bf16[128,256], index: 3, kind: input, shape index: {}]   ;;  %s2689_s4 = inlined_call_operand.vmem [shape: f32[1,256], index: 4, kind: input, shape index: {}]   ;;  %s2690_s5 = inlined_call_operand.vmem [shape: bf16[256,784], index: 5, kind: input, shape index: {}]   ;;  %s2691_s6 = inlined_call_operand.vmem [shape: f32[1,784], index: 6, kind: input, shape index: {}]   ;;  %s2692_s7 = inlined_call_operand.hbm [shape: bf16[8,784], index: 7, kind: output, shape index: {}]  }
   0x1   :  { %v27_v0 = vld [vmem:[%s2685_s0] sm:$0xff]  ;;  %v1196_v1 = vld [vmem:[%s2688_s3 + $0x70] sm:$0xf]  ;;  %1781 = vset.pattern.permute.xlu0 %v1826_v2  ;;  %v1665_v3 = vld [vmem:[%s2688_s3 + $0x74] sm:$0xf0] }
   0x2   :  { %v1664_v4 = vld [vmem:[%s2688_s3 + $0x74] sm:$0xf]  ;;  %v1198_v5 = vld [vmem:[%s2688_s3 + $0x78] sm:$0xf0]  ;;  %31 = vperm.xlu0 %1781, %v27_v0   ;;  %v1197_v6 = vor.u32 %v1665_v3, %v1196_v1  ;;  %v1188_v8 = vld [vmem:[%s2688_s3 + $0x60] sm:$0xf] }
   0x3   :  { %v1201_v7 = vor.u32 %v1664_v4, %v1198_v5  ;;  %v1663_v9 = vld [vmem:[%s2688_s3 + $0x64] sm:$0xf0]  ;;  %v1662_v10 = vld [vmem:[%s2688_s3 + $0x64] sm:$0xf]  ;;  %v1190_v11 = vld [vmem:[%s2688_s3 + $0x68] sm:$0xf0] }
   0x4   :  { %v1180_v12 = vld [vmem:[%s2688_s3 + $0x50] sm:$0xf]  ;;  %153 = vmatpush.bf16.msra.mxu0 %v1197_v6  ;;  %v1189_v13 = vor.u32 %v1663_v9, %v1188_v8  ;;  %v1193_v14 = vor.u32 %v1662_v10, %v1190_v11  ;;  %v1661_v15 = vld [vmem:[%s2688_s3 + $0x54] sm:$0xf0]  ;;  %v1660_v16 = vld [vmem:[%s2688_s3 + $0x54] sm:$0xf] }
   0x5   :  { %166 = vmatpush.bf16.msra.mxu1 %v1201_v7  ;;  %v1182_v17 = vld [vmem:[%s2688_s3 + $0x58] sm:$0xf0] }
   0x6   :  { %12 = vsyncpa [#allocation3], 0  ;;  %v1181_v18 = vor.u32 %v1661_v15, %v1180_v12  ;;  %v1185_v19 = vor.u32 %v1660_v16, %v1182_v17  ;;  %v1827_v20 = vmov 1   ;;  %v1172_v21 = vld [vmem:[%s2688_s3 + $0x40] sm:$0xf]  ;;  %s1129_s20 = sshll.u32 %s2692_s7, 4  ;;  %s1130_s20 = int_to_ptr.hbm [resolvable:$true] %s1129_s20 }
   0x7   :  { %v1659_v22 = vld [vmem:[%s2688_s3 + $0x44] sm:$0xf0]  ;;  %v1658_v23 = vld [vmem:[%s2688_s3 + $0x44] sm:$0xf]  ;;  %v1174_v25 = vld [vmem:[%s2688_s3 + $0x48] sm:$0xf0] }
   0x8   :  { %154 = vmatpush.bf16.msra.mxu0 %v1189_v13  ;;  %v1173_v24 = vor.u32 %v1659_v22, %v1172_v21  ;;  %v1177_v26 = vor.u32 %v1658_v23, %v1174_v25  ;;  %v1164_v27 = vld [vmem:[%s2688_s3 + $0x30] sm:$0xf]  ;;  %v1657_v28 = vld [vmem:[%s2688_s3 + $0x34] sm:$0xf0]  ;;  %v1656_v29 = vld [vmem:[%s2688_s3 + $0x34] sm:$0xf] }
   0x9   :  { %167 = vmatpush.bf16.msra.mxu1 %v1193_v14  ;;  %v1165_v30 = vor.u32 %v1657_v28, %v1164_v27  ;;  %v1166_v31 = vld [vmem:[%s2688_s3 + $0x38] sm:$0xf0]  ;;  %v1156_v32 = vld [vmem:[%s2688_s3 + $0x20] sm:$0xf]  ;;  %v1655_v33 = vld [vmem:[%s2688_s3 + $0x24] sm:$0xf0] }
   0xa   :  { %1782 = vset.pattern.permute.xlu0 %v1827_v20  ;;  %v1169_v34 = vor.u32 %v1656_v29, %v1166_v31  ;;  %v1654_v35 = vld [vmem:[%s2688_s3 + $0x24] sm:$0xf]  ;;  %v1158_v36 = vld [vmem:[%s2688_s3 + $0x28] sm:$0xf0]  ;;  %v1157_v37 = vor.u32 %v1655_v33, %v1156_v32  ;;  %v1148_v39 = vld [vmem:[%s2688_s3 + $0x10] sm:$0xf] }
   0xb   :  { %38 = vperm.xlu0 %1782, %v27_v0   ;;  %v1161_v38 = vor.u32 %v1654_v35, %v1158_v36  ;;  %v1653_v40 = vld [vmem:[%s2688_s3 + $0x14] sm:$0xf0]  ;;  %v1652_v41 = vld [vmem:[%s2688_s3 + $0x14] sm:$0xf]  ;;  %v1150_v43 = vld [vmem:[%s2688_s3 + $0x18] sm:$0xf0] }
   0xc   :  { %155 = vmatpush.bf16.msra.mxu0 %v1181_v18  ;;  %v1149_v42 = vor.u32 %v1653_v40, %v1148_v39  ;;  %v1153_v44 = vor.u32 %v1652_v41, %v1150_v43  ;;  %v1140_v45 = vld [vmem:[%s2688_s3] sm:$0xf]  ;;  %v1651_v46 = vld [vmem:[%s2688_s3 + $0x4] sm:$0xf0]  ;;  %v1650_v47 = vld [vmem:[%s2688_s3 + $0x4] sm:$0xf] }
   0xd   :  { %168 = vmatpush.bf16.msra.mxu1 %v1185_v19  ;;  %v1141_v48 = vor.u32 %v1651_v46, %v1140_v45  ;;  %v1142_v49 = vld [vmem:[%s2688_s3 + $0x8] sm:$0xf0]  ;;  %v1400_v51 = vld [vmem:[%s2690_s5 + $0x188] sm:$0xf]  ;;  %v1718_v52 = vld [vmem:[%s2690_s5 + $0x1a0] sm:$0xf0] }
   0xe   :  { %v1145_v50 = vor.u32 %v1650_v47, %v1142_v49  ;;  %v1624_v53 = vld [vmem:[%s2690_s5 + $0x348] sm:$0xf]  ;;  %v1401_v54 = vor.u32 %v1718_v52, %v1400_v51  ;;  %v1774_v55 = vld [vmem:[%s2690_s5 + $0x360] sm:$0xf0]  ;;  %v1715_v56 = vld [vmem:[%s2690_s5 + $0x18c] sm:$0xf] }
   0xf   :  { %v1402_v57 = vld [vmem:[%s2690_s5 + $0x1a4] sm:$0xf0]  ;;  %v1625_v58 = vor.u32 %v1774_v55, %v1624_v53  ;;  %v1771_v60 = vld [vmem:[%s2690_s5 + $0x34c] sm:$0xf]  ;;  %v1372_v62 = vld [vmem:[%s2690_s5 + $0x150] sm:$0xf] }
  0x10   :  { %156 = vmatpush.bf16.msra.mxu0 %v1173_v24  ;;  %v1405_v59 = vor.u32 %v1715_v56, %v1402_v57  ;;  %v1626_v61 = vld [vmem:[%s2690_s5 + $0x364] sm:$0xf0]  ;;  %903 = vmatpush.bf16.msra.mxu2 %v1401_v54  ;;  %v1711_v0 = vld [vmem:[%s2690_s5 + $0x168] sm:$0xf0]  ;;  %v1596_v1 = vld [vmem:[%s2690_s5 + $0x310] sm:$0xf] }
  0x11   :  { %169 = vmatpush.bf16.msra.mxu1 %v1177_v26  ;;  %v1629_v63 = vor.u32 %v1771_v60, %v1626_v61  ;;  %v1767_v2 = vld [vmem:[%s2690_s5 + $0x328] sm:$0xf0]  ;;  %916 = vmatpush.bf16.msra.mxu3 %v1625_v58  ;;  %v1373_v3 = vor.u32 %v1711_v0, %v1372_v62  ;;  %v1708_v5 = vld [vmem:[%s2690_s5 + $0x154] sm:$0xf]  ;;  %v1374_v6 = vld [vmem:[%s2690_s5 + $0x16c] sm:$0xf0] }
  0x12   :  { %v1597_v4 = vor.u32 %v1767_v2, %v1596_v1  ;;  %v1764_v7 = vld [vmem:[%s2690_s5 + $0x314] sm:$0xf]  ;;  %v1377_v8 = vor.u32 %v1708_v5, %v1374_v6  ;;  %v1598_v9 = vld [vmem:[%s2690_s5 + $0x32c] sm:$0xf0]  ;;  %v1344_v10 = vld [vmem:[%s2690_s5 + $0x118] sm:$0xf] }
  0x13   :  { %v1704_v11 = vld [vmem:[%s2690_s5 + $0x130] sm:$0xf0]  ;;  %v1601_v12 = vor.u32 %v1764_v7, %v1598_v9  ;;  %v1568_v13 = vld [vmem:[%s2690_s5 + $0x2d8] sm:$0xf]  ;;  %v1701_v15 = vld [vmem:[%s2690_s5 + $0x11c] sm:$0xf] }
  0x14   :  { %157 = vmatpush.bf16.msra.mxu0 %v1165_v30  ;;  %v1760_v14 = vld [vmem:[%s2690_s5 + $0x2f0] sm:$0xf0]  ;;  %904 = vmatpush.bf16.msra.mxu2 %v1373_v3  ;;  %v1345_v16 = vor.u32 %v1704_v11, %v1344_v10  ;;  %v1346_v17 = vld [vmem:[%s2690_s5 + $0x134] sm:$0xf0]  ;;  %v1757_v18 = vld [vmem:[%s2690_s5 + $0x2dc] sm:$0xf] }
  0x15   :  { %170 = vmatpush.bf16.msra.mxu1 %v1169_v34  ;;  %v1570_v19 = vld [vmem:[%s2690_s5 + $0x2f4] sm:$0xf0]  ;;  %917 = vmatpush.bf16.msra.mxu3 %v1597_v4  ;;  %v1569_v20 = vor.u32 %v1760_v14, %v1568_v13  ;;  %v1349_v21 = vor.u32 %v1701_v15, %v1346_v17  ;;  %v1316_v22 = vld [vmem:[%s2690_s5 + $0xe0] sm:$0xf]  ;;  %v1697_v23 = vld [vmem:[%s2690_s5 + $0xf8] sm:$0xf0] }
  0x16   :  { %v1540_v24 = vld [vmem:[%s2690_s5 + $0x2a0] sm:$0xf]  ;;  %v1573_v25 = vor.u32 %v1757_v18, %v1570_v19  ;;  %v1753_v26 = vld [vmem:[%s2690_s5 + $0x2b8] sm:$0xf0]  ;;  %v1694_v27 = vld [vmem:[%s2690_s5 + $0xe4] sm:$0xf]  ;;  %v1317_v31 = vor.u32 %v1697_v23, %v1316_v22 }
  0x17   :  { %v1318_v28 = vld [vmem:[%s2690_s5 + $0xfc] sm:$0xf0]  ;;  %v1750_v29 = vld [vmem:[%s2690_s5 + $0x2a4] sm:$0xf]  ;;  %v1541_v33 = vor.u32 %v1753_v26, %v1540_v24  ;;  %v1288_v35 = vld [vmem:[%s2690_s5 + $0xa8] sm:$0xf] }
  0x18   :  { %158 = vmatpush.bf16.msra.mxu0 %v1157_v37  ;;  %v1542_v30 = vld [vmem:[%s2690_s5 + $0x2bc] sm:$0xf0]  ;;  %905 = vmatpush.bf16.msra.mxu2 %v1345_v16  ;;  %v1321_v34 = vor.u32 %v1694_v27, %v1318_v28  ;;  %v1690_v36 = vld [vmem:[%s2690_s5 + $0xc0] sm:$0xf0]  ;;  %v1512_v37 = vld [vmem:[%s2690_s5 + $0x268] sm:$0xf] }
  0x19   :  { %171 = vmatpush.bf16.msra.mxu1 %v1161_v38  ;;  %918 = vmatpush.bf16.msra.mxu3 %v1569_v20  ;;  %v1545_v38 = vor.u32 %v1750_v29, %v1542_v30  ;;  %v1746_v39 = vld [vmem:[%s2690_s5 + $0x280] sm:$0xf0]  ;;  %v1687_v40 = vld [vmem:[%s2690_s5 + $0xac] sm:$0xf]  ;;  %v1290_v41 = vld [vmem:[%s2690_s5 + $0xc4] sm:$0xf0] }
  0x1a   :  { %v1514_v43 = vld [vmem:[%s2690_s5 + $0x284] sm:$0xf0]  ;;  %v1783_v45 = vld [vmem:[%s2686_s1] ss:$0 sm:$0xff]  ;;  %v1513_v46 = vor.u32 %v1746_v39, %v1512_v37  ;;  %v1293_v47 = vor.u32 %v1687_v40, %v1290_v41  ;;  %v1683_v49 = vld [vmem:[%s2690_s5 + $0x88] sm:$0xf0] }
  0x1b   :  { %v1739_v52 = vld [vmem:[%s2690_s5 + $0x248] sm:$0xf0]  ;;  %v1680_v53 = vld [vmem:[%s2690_s5 + $0x74] sm:$0xf]  ;;  %v1262_v54 = vld [vmem:[%s2690_s5 + $0x8c] sm:$0xf0] }
  0x1c   :  { %159 = vmatpush.bf16.msra.mxu0 %v1149_v42  ;;  %v1743_v42 = vld [vmem:[%s2690_s5 + $0x26c] sm:$0xf]  ;;  %906 = vmatpush.bf16.msra.mxu2 %v1317_v31  ;;  %v1784_v55 = vld [vmem:[%s2686_s1 + $0x1] ss:$0 sm:$0xff]  ;;  %v1736_v56 = vld [vmem:[%s2690_s5 + $0x234] sm:$0xf]  ;;  %v1265_v60 = vor.u32 %v1680_v53, %v1262_v54 }
  0x1d   :  { %172 = vmatpush.bf16.msra.mxu1 %v1153_v44  ;;  %v1289_v44 = vor.u32 %v1690_v36, %v1288_v35  ;;  %919 = vmatpush.bf16.msra.mxu3 %v1541_v33  ;;  %v1517_v51 = vor.u32 %v1743_v42, %v1514_v43  ;;  %v1486_v57 = vld [vmem:[%s2690_s5 + $0x24c] sm:$0xf0]  ;;  %v1232_v61 = vld [vmem:[%s2690_s5 + $0x38] sm:$0xf]  ;;  %v1676_v62 = vld [vmem:[%s2690_s5 + $0x50] sm:$0xf0] }
  0x1e   :  { %v1489_v1 = vor.u32 %v1736_v56, %v1486_v57  ;;  %v1732_v2 = vld [vmem:[%s2690_s5 + $0x210] sm:$0xf0]  ;;  %v1673_v3 = vld [vmem:[%s2690_s5 + $0x3c] sm:$0xf]  ;;  %v1234_v4 = vld [vmem:[%s2690_s5 + $0x54] sm:$0xf0]  ;;  %v1233_v10 = vor.u32 %v1676_v62, %v1232_v61 }
  0x1f   :  { %v1785_v7 = vld [vmem:[%s2687_s2] ss:$0 sm:$0xff]  ;;  %v1458_v9 = vld [vmem:[%s2690_s5 + $0x214] sm:$0xf0]  ;;  %v1237_v13 = vor.u32 %v1673_v3, %v1234_v4  ;;  %v1669_v15 = vld [vmem:[%s2690_s5 + $0x18] sm:$0xf0] }
  0x20   :  { %160 = vmatpush.bf16.msra.mxu0 %v1141_v48  ;;  %v1260_v48 = vld [vmem:[%s2690_s5 + $0x70] sm:$0xf]  ;;  %907 = vmatpush.bf16.msra.mxu2 %v1289_v44  ;;  %v1204_v14 = vld [vmem:[%s2690_s5] sm:$0xf]  ;;  %v1725_v18 = vld [vmem:[%s2690_s5 + $0x1d8] sm:$0xf0] }
  0x21   :  { %173 = vmatpush.bf16.msra.mxu1 %v1145_v50  ;;  %v1484_v50 = vld [vmem:[%s2690_s5 + $0x230] sm:$0xf]  ;;  %v1261_v58 = vor.u32 %v1683_v49, %v1260_v48  ;;  %920 = vmatpush.bf16.msra.mxu3 %v1513_v46  ;;  %v1428_v16 = vld [vmem:[%s2690_s5 + $0x1c0] sm:$0xf]  ;;  %v1666_v19 = vld [vmem:[%s2690_s5 + $0x4] sm:$0xf] }
  0x22   :  { %v1206_v20 = vld [vmem:[%s2690_s5 + $0x1c] sm:$0xf0]  ;;  %v1722_v22 = vld [vmem:[%s2690_s5 + $0x1c4] sm:$0xf]  ;;  %v1408_v24 = vld [vmem:[%s2690_s5 + $0x190] sm:$0xf] }
  0x23   :  { %v1430_v23 = vld [vmem:[%s2690_s5 + $0x1dc] sm:$0xf0]  ;;  %v1719_v26 = vld [vmem:[%s2690_s5 + $0x1a8] sm:$0xf0]  ;;  %v1632_v27 = vld [vmem:[%s2690_s5 + $0x350] sm:$0xf]  ;;  %v1209_v33 = vor.u32 %v1666_v19, %v1206_v20 }
  0x24   :  { %929 = vmatpush.bf16.msrb.mxu0 %v1405_v59  ;;  %v1485_v59 = vor.u32 %v1739_v52, %v1484_v50  ;;  %908 = vmatpush.bf16.msra.mxu2 %v1261_v58  ;;  %v1775_v28 = vld [vmem:[%s2690_s5 + $0x368] sm:$0xf0]  ;;  %v1716_v30 = vld [vmem:[%s2690_s5 + $0x194] sm:$0xf]  ;;  %v1410_v31 = vld [vmem:[%s2690_s5 + $0x1ac] sm:$0xf0]  ;;  %v1433_v37 = vor.u32 %v1722_v22, %v1430_v23 }
  0x25   :  { %942 = vmatpush.bf16.msrb.mxu1 %v1629_v63  ;;  %v1456_v63 = vld [vmem:[%s2690_s5 + $0x1f8] sm:$0xf]  ;;  %v1634_v35 = vld [vmem:[%s2690_s5 + $0x36c] sm:$0xf0]  ;;  %v1633_v39 = vor.u32 %v1775_v28, %v1632_v27  ;;  %v1413_v40 = vor.u32 %v1716_v30, %v1410_v31  ;;  %v1712_v42 = vld [vmem:[%s2690_s5 + $0x170] sm:$0xf0] }
  0x26   :  { %921 = vmatpush.bf16.msra.mxu3 %v1485_v59  ;;  %v1380_v41 = vld [vmem:[%s2690_s5 + $0x158] sm:$0xf]  ;;  %v1709_v46 = vld [vmem:[%s2690_s5 + $0x15c] sm:$0xf]  ;;  %v1352_v53 = vld [vmem:[%s2690_s5 + $0x120] sm:$0xf] }
  0x27   :  { %v1604_v43 = vld [vmem:[%s2690_s5 + $0x318] sm:$0xf]  ;;  %v1765_v48 = vld [vmem:[%s2690_s5 + $0x31c] sm:$0xf]  ;;  %v1381_v50 = vor.u32 %v1712_v42, %v1380_v41  ;;  %v1702_v58 = vld [vmem:[%s2690_s5 + $0x124] sm:$0xf] }
  0x28   :  { %930 = vmatpush.bf16.msrb.mxu0 %v1377_v8  ;;  %v1729_v8 = vld [vmem:[%s2690_s5 + $0x1fc] sm:$0xf]  ;;  %909 = vmatpush.bf16.msra.mxu2 %v1233_v10  ;;  %v1606_v49 = vld [vmem:[%s2690_s5 + $0x334] sm:$0xf0]  ;;  %v1354_v59 = vld [vmem:[%s2690_s5 + $0x13c] sm:$0xf0] }
  0x29   :  { %943 = vmatpush.bf16.msrb.mxu1 %v1601_v12  ;;  %v1457_v12 = vor.u32 %v1732_v2, %v1456_v63  ;;  %v1461_v17 = vor.u32 %v1729_v8, %v1458_v9  ;;  %v1705_v54 = vld [vmem:[%s2690_s5 + $0x138] sm:$0xf0]  ;;  %v1609_v56 = vor.u32 %v1765_v48, %v1606_v49  ;;  %v1578_v61 = vld [vmem:[%s2690_s5 + $0x2fc] sm:$0xf0]  ;;  %v1698_v2 = vld [vmem:[%s2690_s5 + $0x100] sm:$0xf0] }
  0x2a   :  { %v1761_v57 = vld [vmem:[%s2690_s5 + $0x2f8] sm:$0xf0]  ;;  %v1353_v62 = vor.u32 %v1705_v54, %v1352_v53  ;;  %v1548_v3 = vld [vmem:[%s2690_s5 + $0x2a8] sm:$0xf]  ;;  %v1751_v8 = vld [vmem:[%s2690_s5 + $0x2ac] sm:$0xf] }
  0x2b   :  { %922 = vmatpush.bf16.msra.mxu3 %v1457_v12  ;;  %v1550_v9 = vld [vmem:[%s2690_s5 + $0x2c4] sm:$0xf0]  ;;  %v1298_v19 = vld [vmem:[%s2690_s5 + $0xcc] sm:$0xf0]  ;;  %v1744_v20 = vld [vmem:[%s2690_s5 + $0x274] sm:$0xf] }
  0x2c   :  { %931 = vmatpush.bf16.msrb.mxu0 %v1349_v21  ;;  %v1492_v27 = vld [vmem:[%s2690_s5 + $0x238] sm:$0xf]  ;;  %v1681_v30 = vld [vmem:[%s2690_s5 + $0x7c] sm:$0xf]  ;;  %v1464_v41 = vld [vmem:[%s2690_s5 + $0x200] sm:$0xf] }
  0x2d   :  { %944 = vmatpush.bf16.msrb.mxu1 %v1573_v25  ;;  %v1205_v25 = vor.u32 %v1669_v15, %v1204_v14  ;;  %v1691_v14 = vld [vmem:[%s2690_s5 + $0xc8] sm:$0xf0]  ;;  %v1520_v15 = vld [vmem:[%s2690_s5 + $0x270] sm:$0xf]  ;;  %v1270_v31 = vld [vmem:[%s2690_s5 + $0x94] sm:$0xf0] }
  0x2e   :  { %v1733_v42 = vld [vmem:[%s2690_s5 + $0x218] sm:$0xf0]  ;;  %v1726_v54 = vld [vmem:[%s2690_s5 + $0x1e0] sm:$0xf0]  ;;  %vm1120_vm0 = vcmask 125952  }
  0x2f   :  { %910 = vmatpush.bf16.msra.mxu2 %v1205_v25  ;;  %v1268_v25 = vld [vmem:[%s2690_s5 + $0x78] sm:$0xf] }
  0x30   :  { %932 = vmatpush.bf16.msrb.mxu0 %v1321_v34  ;;  %v1772_v34 = vld [vmem:[%s2690_s5 + $0x354] sm:$0xf] }
  0x31   :  { %945 = vmatpush.bf16.msrb.mxu1 %v1545_v38  ;;  %v1409_v38 = vor.u32 %v1719_v26, %v1408_v24  ;;  %v1637_v44 = vor.u32 %v1772_v34, %v1634_v35  ;;  %v1684_v26 = vld [vmem:[%s2690_s5 + $0x90] sm:$0xf0] }
  0x32   :  { %v1269_v34 = vor.u32 %v1684_v26, %v1268_v25  ;;  %v1710_v25 = vld [vmem:[%s2690_s5 + $0x164] sm:$0xf]  ;;  %v1390_v26 = vld [vmem:[%s2690_s5 + $0x17c] sm:$0xf0] }
  0x33   :  { %955 = vmatpush.bf16.msrb.mxu2 %v1409_v38  ;;  %v1240_v38 = vld [vmem:[%s2690_s5 + $0x40] sm:$0xf] }
  0x34   :  { %933 = vmatpush.bf16.msrb.mxu0 %v1293_v47  ;;  %v1382_v47 = vld [vmem:[%s2690_s5 + $0x174] sm:$0xf0] }
  0x35   :  { %946 = vmatpush.bf16.msrb.mxu1 %v1517_v51  ;;  %v1385_v52 = vor.u32 %v1709_v46, %v1382_v47  ;;  %v1730_v46 = vld [vmem:[%s2690_s5 + $0x204] sm:$0xf]  ;;  %v1466_v47 = vld [vmem:[%s2690_s5 + $0x21c] sm:$0xf0] }
  0x36   :  { %v1469_v49 = vor.u32 %v1730_v46, %v1466_v47  ;;  %v1699_v46 = vld [vmem:[%s2690_s5 + $0x108] sm:$0xf0] }
  0x37   :  { %956 = vmatpush.bf16.msrb.mxu2 %v1381_v50  ;;  %v1212_v50 = vld [vmem:[%s2690_s5 + $0x8] sm:$0xf] }
  0x38   :  { %934 = vmatpush.bf16.msrb.mxu0 %v1265_v60  ;;  %v1758_v60 = vld [vmem:[%s2690_s5 + $0x2e4] sm:$0xf] }
  0x39   :  { %947 = vmatpush.bf16.msrb.mxu1 %v1489_v1  ;;  %v1324_v1 = vld [vmem:[%s2690_s5 + $0xe8] sm:$0xf]  ;;  %v1581_v4 = vor.u32 %v1758_v60, %v1578_v61 }
  0x3a   :  { %v1325_v10 = vor.u32 %v1698_v2, %v1324_v1  ;;  %v1438_v60 = vld [vmem:[%s2690_s5 + $0x1e4] sm:$0xf0] }
  0x3b   :  { %957 = vmatpush.bf16.msrb.mxu2 %v1353_v62  ;;  %v67_v62 = vld [vmem:[%s2689_s4] sm:$0x3] }
  0x3c   :  { %935 = vmatpush.bf16.msrb.mxu0 %v1237_v13  ;;  %v1296_v13 = vld [vmem:[%s2690_s5 + $0xb0] sm:$0xf] }
  0x3d   :  { %948 = vmatpush.bf16.msrb.mxu1 %v1461_v17  ;;  %v1747_v17 = vld [vmem:[%s2690_s5 + $0x288] sm:$0xf0]  ;;  %v1297_v22 = vor.u32 %v1691_v14, %v1296_v13  ;;  %v1773_v13 = vld [vmem:[%s2690_s5 + $0x35c] sm:$0xf]  ;;  %v1642_v14 = vld [vmem:[%s2690_s5 + $0x374] sm:$0xf0] }
  0x3e   :  { %v1521_v23 = vor.u32 %v1747_v17, %v1520_v15 }
  0x3f   :  { %958 = vmatpush.bf16.msrb.mxu2 %v1325_v10  ;;  %v1418_v10 = vld [vmem:[%s2690_s5 + $0x1b4] sm:$0xf0] }
  0x40   :  { %936 = vmatpush.bf16.msrb.mxu0 %v1209_v33  ;;  %v1494_v33 = vld [vmem:[%s2690_s5 + $0x254] sm:$0xf0] }
  0x41   :  { %949 = vmatpush.bf16.msrb.mxu1 %v1433_v37 }
  0x43   :  { %959 = vmatpush.bf16.msrb.mxu2 %v1297_v22  ;;  %v1645_v22 = vor.u32 %v1773_v13, %v1642_v14  ;;  %v1738_v13 = vld [vmem:[%s2690_s5 + $0x244] sm:$0xf]  ;;  %v1502_v14 = vld [vmem:[%s2690_s5 + $0x25c] sm:$0xf0] }
  0x47   :  { %960 = vmatpush.bf16.msrb.mxu2 %v1269_v34  ;;  %v1706_v34 = vld [vmem:[%s2690_s5 + $0x140] sm:$0xf0] }
  0x74   :  { %v32_v32 = vpop.permute.xlu0 %31 }
  0x75   :  { %v35_v5 = vmul.f32 %v1783_v45, %v32_v32  ;;  %v1429_v32 = vor.u32 %v1725_v18, %v1428_v16  ;;  %v1768_v45 = vld [vmem:[%s2690_s5 + $0x330] sm:$0xf0]  ;;  %v1553_v16 = vor.u32 %v1751_v8, %v1550_v9  ;;  %v1717_v9 = vld [vmem:[%s2690_s5 + $0x19c] sm:$0xf] }
  0x76   :  { %v1605_v51 = vor.u32 %v1768_v45, %v1604_v43  ;;  %v1688_v18 = vld [vmem:[%s2690_s5 + $0xb4] sm:$0xf]  ;;  %v1674_v43 = vld [vmem:[%s2690_s5 + $0x44] sm:$0xf]  ;;  %v1242_v45 = vld [vmem:[%s2690_s5 + $0x5c] sm:$0xf0] }
  0x77   :  { %923 = vmatpush.bf16.msra.mxu3 %v1429_v32  ;;  %v1301_v24 = vor.u32 %v1688_v18, %v1298_v19  ;;  %v1737_v32 = vld [vmem:[%s2690_s5 + $0x23c] sm:$0xf]  ;;  %v1245_v48 = vor.u32 %v1674_v43, %v1242_v45  ;;  %v1776_v8 = vld [vmem:[%s2690_s5 + $0x370] sm:$0xf0]  ;;  %v1388_v19 = vld [vmem:[%s2690_s5 + $0x160] sm:$0xf] }
  0x78   :  { %v1497_v37 = vor.u32 %v1737_v32, %v1494_v33  ;;  %v1360_v33 = vld [vmem:[%s2690_s5 + $0x128] sm:$0xf]  ;;  %v1332_v45 = vld [vmem:[%s2690_s5 + $0xf0] sm:$0xf] }
  0x79   :  { %v1361_v43 = vor.u32 %v1706_v34, %v1360_v33  ;;  %v1444_v33 = vld [vmem:[%s2690_s5 + $0x1d0] sm:$0xf] }
  0x7b   :  { %968 = vmatpush.bf16.msrb.mxu3 %v1633_v39  ;;  %v1677_v39 = vld [vmem:[%s2690_s5 + $0x58] sm:$0xf0] }
  0x7d   :  { %v39_v0 = vpop.permute.xlu0 %38 }
  0x7e   :  { %v42_v6 = vmul.f32 %v1784_v55, %v39_v0  ;;  %v1576_v55 = vld [vmem:[%s2690_s5 + $0x2e0] sm:$0xf]  ;;  %v1357_v0 = vor.u32 %v1702_v58, %v1354_v59  ;;  %v1723_v58 = vld [vmem:[%s2690_s5 + $0x1cc] sm:$0xf] }
  0x7f   :  { %969 = vmatpush.bf16.msrb.mxu3 %v1605_v51  ;;  %v1577_v63 = vor.u32 %v1761_v57, %v1576_v55  ;;  %v1670_v51 = vld [vmem:[%s2690_s5 + $0x20] sm:$0xf0]  ;;  %v1214_v57 = vld [vmem:[%s2690_s5 + $0x24] sm:$0xf0]  ;;  %v1441_v61 = vor.u32 %v1723_v58, %v1438_v60  ;;  %v1692_v58 = vld [vmem:[%s2690_s5 + $0xd0] sm:$0xf0] }
  0x80   :  { %v43_v11 = vadd.f32 %v42_v6, %v35_v5  ;;  %v1754_v5 = vld [vmem:[%s2690_s5 + $0x2c0] sm:$0xf0]  ;;  %v1695_v6 = vld [vmem:[%s2690_s5 + $0xec] sm:$0xf]  ;;  %v1213_v53 = vor.u32 %v1670_v51, %v1212_v50  ;;  %v1696_v51 = vld [vmem:[%s2690_s5 + $0xf4] sm:$0xf] }
  0x81   :  { %v1755_v50 = vld [vmem:[%s2690_s5 + $0x2c8] sm:$0xf0] }
  0x82   :  { %v48_v21 = vadd.f32 %v1785_v7, %v43_v11  ;;  %v1326_v7 = vld [vmem:[%s2690_s5 + $0x104] sm:$0xf0]  ;;  %v1549_v11 = vor.u32 %v1754_v5, %v1548_v3  ;;  %v1416_v5 = vld [vmem:[%s2690_s5 + $0x198] sm:$0xf] }
  0x83   :  { %970 = vmatpush.bf16.msrb.mxu3 %v1577_v63  ;;  %v1329_v12 = vor.u32 %v1695_v6, %v1326_v7  ;;  %v69_v63 = vperm.slane %v67_v62, 0  ;;  %v1720_v6 = vld [vmem:[%s2690_s5 + $0x1b0] sm:$0xf0]  ;;  %v1640_v7 = vld [vmem:[%s2690_s5 + $0x358] sm:$0xf] }
  0x84   :  { %v49_v29 = vmax.f32 %v48_v21, 0.0  ;;  %v1522_v21 = vld [vmem:[%s2690_s5 + $0x28c] sm:$0xf0]  ;;  %v1417_v17 = vor.u32 %v1720_v6, %v1416_v5  ;;  %v1641_v18 = vor.u32 %v1776_v8, %v1640_v7  ;;  %v1276_v5 = vld [vmem:[%s2690_s5 + $0x80] sm:$0xf] }
  0x85   :  { %v1525_v28 = vor.u32 %v1744_v20, %v1522_v21  ;;  %v1713_v20 = vld [vmem:[%s2690_s5 + $0x178] sm:$0xf0]  ;;  %v1421_v21 = vor.u32 %v1717_v9, %v1418_v10  ;;  %v1500_v9 = vld [vmem:[%s2690_s5 + $0x240] sm:$0xf] }
  0x86   :  { %v50_v36 = vpack.c.bf16 %v49_v29, %v49_v29  ;;  %v1740_v29 = vld [vmem:[%s2690_s5 + $0x250] sm:$0xf0]  ;;  %v1685_v6 = vld [vmem:[%s2690_s5 + $0x98] sm:$0xf0] }
  0x87   :  { %971 = vmatpush.bf16.msrb.mxu3 %v1549_v11  ;;  %v1493_v35 = vor.u32 %v1740_v29, %v1492_v27  ;;  %v1766_v27 = vld [vmem:[%s2690_s5 + $0x324] sm:$0xf]  ;;  %v1741_v10 = vld [vmem:[%s2690_s5 + $0x258] sm:$0xf0] }
  0x88   :  { %161 = vmatmul.bf16.vlgmr.msra.gmra.mxu0 %v50_v36  ;;  %174 = vmatmul.bf16.vlgmr.msra.gmra.mxu1 %v50_v36  ;;  %v1273_v36 = vor.u32 %v1681_v30, %v1270_v31  ;;  %v1389_v31 = vor.u32 %v1713_v20, %v1388_v19  ;;  %v1248_v19 = vld [vmem:[%s2690_s5 + $0x48] sm:$0xf]  ;;  %v1678_v20 = vld [vmem:[%s2690_s5 + $0x60] sm:$0xf0] }
  0x89   :  { %981 = vmatpush.bf16.msra.mxu0 %v1413_v40  ;;  %994 = vmatpush.bf16.msra.mxu1 %v1637_v44  ;;  %v1241_v40 = vor.u32 %v1677_v39, %v1240_v38  ;;  %v1465_v44 = vor.u32 %v1733_v42, %v1464_v41  ;;  %v1762_v38 = vld [vmem:[%s2690_s5 + $0x300] sm:$0xf0]  ;;  %v1703_v39 = vld [vmem:[%s2690_s5 + $0x12c] sm:$0xf]  ;;  %v1586_v42 = vld [vmem:[%s2690_s5 + $0x304] sm:$0xf0] }
  0x8a   :  { %v1759_v41 = vld [vmem:[%s2690_s5 + $0x2ec] sm:$0xf] }
  0x8b   :  { %972 = vmatpush.bf16.msrb.mxu3 %v1521_v23  ;;  %961 = vmatpush.bf16.msrb.mxu2 %v1241_v40  ;;  %v1612_v23 = vld [vmem:[%s2690_s5 + $0x320] sm:$0xf]  ;;  %v1362_v40 = vld [vmem:[%s2690_s5 + $0x144] sm:$0xf0] }
  0x8c   :  { %v1365_v47 = vor.u32 %v1703_v39, %v1362_v40  ;;  %v1724_v39 = vld [vmem:[%s2690_s5 + $0x1d4] sm:$0xf]  ;;  %v1446_v40 = vld [vmem:[%s2690_s5 + $0x1ec] sm:$0xf0] }
  0x8d   :  { %982 = vmatpush.bf16.msra.mxu0 %v1385_v52  ;;  %995 = vmatpush.bf16.msra.mxu1 %v1609_v56  ;;  %v1436_v52 = vld [vmem:[%s2690_s5 + $0x1c8] sm:$0xf]  ;;  %v1667_v56 = vld [vmem:[%s2690_s5 + $0xc] sm:$0xf] }
  0x8e   :  { %v1437_v55 = vor.u32 %v1726_v54, %v1436_v52  ;;  %v1217_v59 = vor.u32 %v1667_v56, %v1214_v57  ;;  %v1334_v52 = vld [vmem:[%s2690_s5 + $0x10c] sm:$0xf0]  ;;  %v1304_v57 = vld [vmem:[%s2690_s5 + $0xb8] sm:$0xf] }
  0x8f   :  { %973 = vmatpush.bf16.msrb.mxu3 %v1493_v35  ;;  %962 = vmatpush.bf16.msrb.mxu2 %v1213_v53  ;;  %v1393_v35 = vor.u32 %v1710_v25, %v1390_v26  ;;  %v1752_v53 = vld [vmem:[%s2690_s5 + $0x2b4] sm:$0xf]  ;;  %v1558_v54 = vld [vmem:[%s2690_s5 + $0x2cc] sm:$0xf0]  ;;  %v1675_v25 = vld [vmem:[%s2690_s5 + $0x4c] sm:$0xf] }
  0x90   :  { %v1561_v60 = vor.u32 %v1752_v53, %v1558_v54  ;;  %v1250_v26 = vld [vmem:[%s2690_s5 + $0x64] sm:$0xf0]  ;;  %v1770_v54 = vld [vmem:[%s2690_s5 + $0x340] sm:$0xf0] }
  0x91   :  { %983 = vmatpush.bf16.msra.mxu0 %v1357_v0  ;;  %996 = vmatpush.bf16.msra.mxu1 %v1581_v4  ;;  %v70_v0 = vperm.slane %v67_v62, 1  ;;  %v1748_v62 = vld [vmem:[%s2690_s5 + $0x290] sm:$0xf0]  ;;  %v1253_v34 = vor.u32 %v1675_v25, %v1250_v26  ;;  %v1620_v53 = vld [vmem:[%s2690_s5 + $0x328] sm:$0xf] }
  0x92   :  { %v1228_v25 = vld [vmem:[%s2690_s5 + $0x18] sm:$0xf]  ;;  %v1672_v26 = vld [vmem:[%s2690_s5 + $0x30] sm:$0xf0] }
  0x93   :  { %974 = vmatpush.bf16.msrb.mxu3 %v1465_v44 }
  0x95   :  { %984 = vmatpush.bf16.msra.mxu0 %v1329_v12  ;;  %997 = vmatpush.bf16.msra.mxu1 %v1553_v16 }
  0x97   :  { %975 = vmatpush.bf16.msrb.mxu3 %v1437_v55  ;;  %v1333_v55 = vor.u32 %v1699_v46, %v1332_v45 }
  0x99   :  { %985 = vmatpush.bf16.msra.mxu0 %v1301_v24  ;;  %998 = vmatpush.bf16.msra.mxu1 %v1525_v28  ;;  %v1769_v24 = vld [vmem:[%s2690_s5 + $0x338] sm:$0xf0]  ;;  %v1614_v28 = vld [vmem:[%s2690_s5 + $0x33c] sm:$0xf0] }
  0x9a   :  { %v1613_v32 = vor.u32 %v1769_v24, %v1612_v23  ;;  %v1472_v23 = vld [vmem:[%s2690_s5 + $0x208] sm:$0xf]  ;;  %v1734_v24 = vld [vmem:[%s2690_s5 + $0x220] sm:$0xf0] }
  0x9d   :  { %986 = vmatpush.bf16.msra.mxu0 %v1273_v36  ;;  %999 = vmatpush.bf16.msra.mxu1 %v1497_v37  ;;  %v1617_v36 = vor.u32 %v1766_v27, %v1614_v28  ;;  %v1584_v37 = vld [vmem:[%s2690_s5 + $0x2e8] sm:$0xf]  ;;  %v1731_v27 = vld [vmem:[%s2690_s5 + $0x20c] sm:$0xf] }
  0x9e   :  { %v1585_v44 = vor.u32 %v1762_v38, %v1584_v37  ;;  %v1474_v28 = vld [vmem:[%s2690_s5 + $0x224] sm:$0xf0]  ;;  %v1668_v37 = vld [vmem:[%s2690_s5 + $0x14] sm:$0xf]  ;;  %v1222_v38 = vld [vmem:[%s2690_s5 + $0x2c] sm:$0xf0] }
  0xa1   :  { %987 = vmatpush.bf16.msra.mxu0 %v1245_v48  ;;  %1000 = vmatpush.bf16.msra.mxu1 %v1469_v49  ;;  %v1589_v48 = vor.u32 %v1759_v41, %v1586_v42  ;;  %v1556_v49 = vld [vmem:[%s2690_s5 + $0x2b0] sm:$0xf]  ;;  %v1424_v41 = vld [vmem:[%s2690_s5 + $0x1a0] sm:$0xf]  ;;  %v1721_v42 = vld [vmem:[%s2690_s5 + $0x1b8] sm:$0xf0] }
  0xa2   :  { %v1557_v56 = vor.u32 %v1755_v50, %v1556_v49  ;;  %v1425_v49 = vor.u32 %v1721_v42, %v1424_v41 }
  0xa5   :  { %988 = vmatpush.bf16.msra.mxu0 %v1217_v59  ;;  %1001 = vmatpush.bf16.msra.mxu1 %v1441_v61  ;;  %v1337_v59 = vor.u32 %v1696_v51, %v1334_v52  ;;  %v1528_v61 = vld [vmem:[%s2690_s5 + $0x278] sm:$0xf]  ;;  %v1396_v51 = vld [vmem:[%s2690_s5 + $0x168] sm:$0xf]  ;;  %v1714_v52 = vld [vmem:[%s2690_s5 + $0x180] sm:$0xf0] }
 0x105   :  { %v162_v1 = vpop.f32.mrf.mxu0  ;;  %v175_v2 = vpop.f32.mrf.mxu1 }
 0x106   :  { %v163_v3 = vadd.f32 %v162_v1, %v69_v63  ;;  %v176_v4 = vadd.f32 %v175_v2, %v70_v0  ;;  %v1689_v63 = vld [vmem:[%s2690_s5 + $0xbc] sm:$0xf]  ;;  %v1306_v0 = vld [vmem:[%s2690_s5 + $0xd4] sm:$0xf0] }
 0x107   :  { %v1745_v1 = vld [vmem:[%s2690_s5 + $0x27c] sm:$0xf]  ;;  %v1530_v2 = vld [vmem:[%s2690_s5 + $0x294] sm:$0xf0]  ;;  %v1309_v7 = vor.u32 %v1689_v63, %v1306_v0  ;;  %v1700_v0 = vld [vmem:[%s2690_s5 + $0x110] sm:$0xf0] }
 0x108   :  { %v179_v11 = vmax.f32 %v163_v3, 0.0  ;;  %v180_v12 = vmax.f32 %v176_v4, 0.0  ;;  %v1305_v3 = vor.u32 %v1692_v58, %v1304_v57  ;;  %v1529_v4 = vor.u32 %v1748_v62, %v1528_v61  ;;  %v1368_v57 = vld [vmem:[%s2690_s5 + $0x130] sm:$0xf]  ;;  %v1707_v58 = vld [vmem:[%s2690_s5 + $0x148] sm:$0xf0] }
 0x109   :  { %v1533_v8 = vor.u32 %v1745_v1, %v1530_v2  ;;  %v1369_v61 = vor.u32 %v1707_v58, %v1368_v57  ;;  %v1340_v63 = vld [vmem:[%s2690_s5 + $0xf8] sm:$0xf]  ;;  %v1756_v2 = vld [vmem:[%s2690_s5 + $0x2d0] sm:$0xf0] }
 0x10a   :  { %v2388_v15 = vpack.c.bf16 %v179_v11, %v179_v11  ;;  %v2390_v16 = vpack.c.bf16 %v180_v12, %v180_v12  ;;  %v1682_v11 = vld [vmem:[%s2690_s5 + $0x84] sm:$0xf]  ;;  %v1278_v12 = vld [vmem:[%s2690_s5 + $0x9c] sm:$0xf0]  ;;  %v1564_v1 = vld [vmem:[%s2690_s5 + $0x2b8] sm:$0xf] }
 0x10c   :  { %911 = vmatmul.bf16.vlgmr.msra.gmra.mxu2 %v2388_v15  ;;  %924 = vmatmul.bf16.vlgmr.msra.gmra.mxu3 %v2390_v16 }
 0x10d   :  { %937 = vmatmul.bf16.vlgmr.msrb.gmra.mxu0 %v2388_v15  ;;  %950 = vmatmul.bf16.vlgmr.msrb.gmra.mxu1 %v2390_v16  ;;  %v164_v29 = vpop.f32.mrf.mxu0  ;;  %v177_v30 = vpop.f32.mrf.mxu1 }
 0x10e   :  { %1007 = vmatpush.bf16.msra.mxu2 %v1417_v17  ;;  %1020 = vmatpush.bf16.msra.mxu3 %v1641_v18  ;;  %v1277_v17 = vor.u32 %v1685_v6, %v1276_v5  ;;  %v1501_v18 = vor.u32 %v1741_v10, %v1500_v9  ;;  %v1249_v29 = vor.u32 %v1678_v20, %v1248_v19  ;;  %v1312_v5 = vld [vmem:[%s2690_s5 + $0xc0] sm:$0xf]  ;;  %v1693_v6 = vld [vmem:[%s2690_s5 + $0xd8] sm:$0xf0]  ;;  %v1256_v19 = vld [vmem:[%s2690_s5 + $0x50] sm:$0xf] }
 0x10f   :  { %1033 = vmatpush.bf16.msrb.mxu0 %v1421_v21  ;;  %1046 = vmatpush.bf16.msrb.mxu1 %v1645_v22  ;;  %v1281_v21 = vor.u32 %v1682_v11, %v1278_v12  ;;  %v1505_v22 = vor.u32 %v1738_v13, %v1502_v14  ;;  %v1473_v30 = vor.u32 %v1734_v24, %v1472_v23  ;;  %v1284_v11 = vld [vmem:[%s2690_s5 + $0x88] sm:$0xf]  ;;  %v1686_v12 = vld [vmem:[%s2690_s5 + $0xa0] sm:$0xf0]  ;;  %v1679_v20 = vld [vmem:[%s2690_s5 + $0x68] sm:$0xf0] }
 0x110   :  { %v1313_v9 = vor.u32 %v1693_v6, %v1312_v5  ;;  %v1508_v13 = vld [vmem:[%s2690_s5 + $0x248] sm:$0xf]  ;;  %v1742_v14 = vld [vmem:[%s2690_s5 + $0x260] sm:$0xf0]  ;;  %v1257_v23 = vor.u32 %v1679_v20, %v1256_v19 }
 0x112   :  { %1008 = vmatpush.bf16.msra.mxu2 %v1389_v31  ;;  %1021 = vmatpush.bf16.msra.mxu3 %v1613_v32  ;;  %v1220_v31 = vld [vmem:[%s2690_s5 + $0x10] sm:$0xf]  ;;  %v1671_v32 = vld [vmem:[%s2690_s5 + $0x28] sm:$0xf0] }
 0x113   :  { %1034 = vmatpush.bf16.msrb.mxu0 %v1393_v35  ;;  %1047 = vmatpush.bf16.msrb.mxu1 %v1617_v36  ;;  %v1477_v35 = vor.u32 %v1731_v27, %v1474_v28  ;;  %v1727_v36 = vld [vmem:[%s2690_s5 + $0x1e8] sm:$0xf0]  ;;  %v1221_v45 = vor.u32 %v1671_v32, %v1220_v31  ;;  %v1452_v27 = vld [vmem:[%s2690_s5 + $0x1d8] sm:$0xf]  ;;  %v1728_v28 = vld [vmem:[%s2690_s5 + $0x1f0] sm:$0xf0] }
 0x114   :  { %v1445_v46 = vor.u32 %v1727_v36, %v1444_v33  ;;  %v2673_v31 = vld [vmem:[%s2691_s6] sm:$0x7f] }
 0x115   :  { %v314_v32 = vperm.slane %v2673_v31, 1  ;;  %v313_v36 = vperm.slane %v2673_v31, 0  ;;  %v318_v6 = vperm.slane %v2673_v31, 5 }
 0x116   :  { %1009 = vmatpush.bf16.msra.mxu2 %v1361_v43  ;;  %1022 = vmatpush.bf16.msra.mxu3 %v1585_v44  ;;  %v1648_v43 = vld [vmem:[%s2690_s5 + $0x360] sm:$0xf]  ;;  %v1777_v44 = vld [vmem:[%s2690_s5 + $0x378] sm:$0xf0] }
 0x117   :  { %1035 = vmatpush.bf16.msrb.mxu0 %v1365_v47  ;;  %1048 = vmatpush.bf16.msrb.mxu1 %v1589_v48  ;;  %v1225_v47 = vor.u32 %v1668_v37, %v1222_v38  ;;  %v1449_v48 = vor.u32 %v1724_v39, %v1446_v40  ;;  %v1649_v50 = vor.u32 %v1777_v44, %v1648_v43 }
 0x11a   :  { %1010 = vmatpush.bf16.msra.mxu2 %v1333_v55  ;;  %1023 = vmatpush.bf16.msra.mxu3 %v1557_v56  ;;  %v1397_v55 = vor.u32 %v1714_v52, %v1396_v51  ;;  %v1621_v56 = vor.u32 %v1770_v54, %v1620_v53  ;;  %v315_v53 = vperm.slane %v2673_v31, 2 }
 0x11b   :  { %1036 = vmatpush.bf16.msrb.mxu0 %v1337_v59  ;;  %1049 = vmatpush.bf16.msrb.mxu1 %v1561_v60  ;;  %v1592_v59 = vld [vmem:[%s2690_s5 + $0x2f0] sm:$0xf]  ;;  %v1763_v60 = vld [vmem:[%s2690_s5 + $0x308] sm:$0xf0] }
 0x11c   :  { %963 = vmatmul.bf16.vlgmr.msrb.gmra.mxu2 %v2388_v15  ;;  %976 = vmatmul.bf16.vlgmr.msrb.gmra.mxu3 %v2390_v16  ;;  %v1593_v62 = vor.u32 %v1763_v60, %v1592_v59 }
 0x11d   :  { %989 = vmatmul.bf16.vlgmr.msra.gmra.mxu0 %v2388_v15  ;;  %1002 = vmatmul.bf16.vlgmr.msra.gmra.mxu1 %v2390_v16 }
 0x11e   :  { %1011 = vmatpush.bf16.msra.mxu2 %v1305_v3  ;;  %1024 = vmatpush.bf16.msra.mxu3 %v1529_v4  ;;  %v1341_v3 = vor.u32 %v1700_v0, %v1340_v63  ;;  %v1565_v4 = vor.u32 %v1756_v2, %v1564_v1 }
 0x11f   :  { %1037 = vmatpush.bf16.msrb.mxu0 %v1309_v7  ;;  %1050 = vmatpush.bf16.msrb.mxu1 %v1533_v8  ;;  %v1536_v7 = vld [vmem:[%s2690_s5 + $0x280] sm:$0xf]  ;;  %v1749_v8 = vld [vmem:[%s2690_s5 + $0x298] sm:$0xf0] }
 0x120   :  { %v1537_v10 = vor.u32 %v1749_v8, %v1536_v7 }
 0x122   :  { %1012 = vmatpush.bf16.msra.mxu2 %v1277_v17  ;;  %1025 = vmatpush.bf16.msra.mxu3 %v1501_v18  ;;  %v1285_v17 = vor.u32 %v1686_v12, %v1284_v11  ;;  %v1509_v18 = vor.u32 %v1742_v14, %v1508_v13  ;;  %v317_v13 = vperm.slane %v2673_v31, 4 }
 0x123   :  { %1038 = vmatpush.bf16.msrb.mxu0 %v1281_v21  ;;  %1051 = vmatpush.bf16.msrb.mxu1 %v1505_v22  ;;  %v1480_v21 = vld [vmem:[%s2690_s5 + $0x210] sm:$0xf]  ;;  %v1735_v22 = vld [vmem:[%s2690_s5 + $0x228] sm:$0xf0]  ;;  %s1828_s5 = smov [#allocation2]  }
 0x124   :  { %v1481_v24 = vor.u32 %v1735_v22, %v1480_v21  ;;  %s1127_s6 = sshll.u32 %s1828_s5, 4  ;;  %s1128_s6 = int_to_ptr.vmem [resolvable:$true] %s1127_s6 }
 0x126   :  { %1013 = vmatpush.bf16.msra.mxu2 %v1249_v29  ;;  %1026 = vmatpush.bf16.msra.mxu3 %v1473_v30  ;;  %v1229_v29 = vor.u32 %v1672_v26, %v1228_v25  ;;  %v1453_v30 = vor.u32 %v1728_v28, %v1452_v27 }
 0x127   :  { %1039 = vmatpush.bf16.msrb.mxu0 %v1253_v34  ;;  %1052 = vmatpush.bf16.msrb.mxu1 %v1477_v35 }
 0x12a   :  { %1014 = vmatpush.bf16.msra.mxu2 %v1221_v45  ;;  %1027 = vmatpush.bf16.msra.mxu3 %v1445_v46  ;;  %v316_v46 = vperm.slane %v2673_v31, 3 }
 0x12b   :  { %1040 = vmatpush.bf16.msrb.mxu0 %v1225_v47  ;;  %1053 = vmatpush.bf16.msrb.mxu1 %v1449_v48 }
 0x12d   :  { %1015 = vmatmul.bf16.vlgmr.msra.gmra.mxu2 %v2388_v15  ;;  %1028 = vmatmul.bf16.vlgmr.msra.gmra.mxu3 %v2390_v16 }
 0x12e   :  { %1059 = vmatpush.bf16.msrb.mxu2 %v1425_v49  ;;  %1072 = vmatpush.bf16.msrb.mxu3 %v1649_v50 }
 0x12f   :  { %1041 = vmatmul.bf16.vlgmr.msrb.gmra.mxu0 %v2388_v15  ;;  %1054 = vmatmul.bf16.vlgmr.msrb.gmra.mxu1 %v2390_v16 }
 0x132   :  { %1060 = vmatpush.bf16.msrb.mxu2 %v1397_v55  ;;  %1073 = vmatpush.bf16.msrb.mxu3 %v1621_v56 }
 0x136   :  { %1061 = vmatpush.bf16.msrb.mxu2 %v1369_v61  ;;  %1074 = vmatpush.bf16.msrb.mxu3 %v1593_v62 }
 0x13a   :  { %1062 = vmatpush.bf16.msrb.mxu2 %v1341_v3  ;;  %1075 = vmatpush.bf16.msrb.mxu3 %v1565_v4 }
 0x13e   :  { %1063 = vmatpush.bf16.msrb.mxu2 %v1313_v9  ;;  %1076 = vmatpush.bf16.msrb.mxu3 %v1537_v10 }
 0x142   :  { %1064 = vmatpush.bf16.msrb.mxu2 %v1285_v17  ;;  %1077 = vmatpush.bf16.msrb.mxu3 %v1509_v18 }
 0x146   :  { %1065 = vmatpush.bf16.msrb.mxu2 %v1257_v23  ;;  %1078 = vmatpush.bf16.msrb.mxu3 %v1481_v24 }
 0x14a   :  { %1066 = vmatpush.bf16.msrb.mxu2 %v1229_v29  ;;  %1079 = vmatpush.bf16.msrb.mxu3 %v1453_v30 }
 0x14d   :  { %1067 = vmatmul.bf16.vlgmr.msrb.gmra.mxu2 %v2388_v15  ;;  %1080 = vmatmul.bf16.vlgmr.msrb.gmra.mxu3 %v2390_v16 }
 0x18a   :  { %v938_v33 = vpop.f32.mrf.mxu0  ;;  %v951_v34 = vpop.f32.mrf.mxu1 }
 0x18b   :  { %v939_v35 = vadd.f32 %v938_v33, %v314_v32 }
 0x18d   :  { %v952_v37 = vadd.f32 %v951_v34, %v939_v35 }
 0x18f   :  { %v1086_v38 = vmul.f32 0.5, %v952_v37  ;;  %v912_v39 = vpop.f32.mrf.mxu2  ;;  %v925_v40 = vpop.f32.mrf.mxu3 }
 0x190   :  { %v913_v41 = vadd.f32 %v912_v39, %v313_v36 }
 0x191   :  { %1786 = vtanh.f32 %v1086_v38  ;;  %v319_v38 = vperm.slane %v2673_v31, 6 }
 0x192   :  { %v926_v15 = vadd.f32 %v925_v40, %v913_v41  ;;  %v940_v16 = vpop.f32.mrf.mxu0  ;;  %v953_v42 = vpop.f32.mrf.mxu1 }
 0x194   :  { %v1085_v43 = vmul.f32 0.5, %v926_v15 }
 0x196   :  { %1788 = vtanh.f32 %v1085_v43 }
 0x197   :  { %v914_v44 = vpop.f32.mrf.mxu2  ;;  %v927_v45 = vpop.f32.mrf.mxu3 }
 0x198   :  { %v1787_v47 = vpop.eup %1786 }
 0x199   :  { %v1100_v50 = vmul.f32 0.5, %v1787_v47 }
 0x19a   :  { %v990_v48 = vpop.f32.mrf.mxu0  ;;  %v1003_v49 = vpop.f32.mrf.mxu1 }
 0x19b   :  { %v991_v51 = vadd.f32 %v990_v48, %v316_v46  ;;  %v1107_v56 = vadd.f32 0.5, %v1100_v50 }
 0x19c   :  { %v1789_v52 = vpop.eup %1788 }
 0x19d   :  { %v1099_v54 = vmul.f32 0.5, %v1789_v52  ;;  %v1004_v55 = vadd.f32 %v1003_v49, %v991_v51 }
 0x19f   :  { %v1106_v57 = vadd.f32 0.5, %v1099_v54  ;;  %v1088_v58 = vmul.f32 0.5, %v1004_v55  ;;  %v964_v59 = vpop.f32.mrf.mxu2  ;;  %v977_v60 = vpop.f32.mrf.mxu3 }
 0x1a0   :  { %v965_v61 = vadd.f32 %v964_v59, %v315_v53 }
 0x1a1   :  { %v1113_v62 = vpack.c.bf16 %v1107_v56, %v1106_v57  ;;  %1790 = vtanh.f32 %v1088_v58 }
 0x1a2   :  { %v978_v63 = vadd.f32 %v977_v60, %v965_v61  ;;  %v992_v0 = vpop.f32.mrf.mxu0  ;;  %v1005_v1 = vpop.f32.mrf.mxu1 }
 0x1a3   :  { %1117 = vst [vmem:[#allocation2] sm:$0xff] %v1113_v62 }
 0x1a4   :  { %v1087_v2 = vmul.f32 0.5, %v978_v63 }
 0x1a6   :  { %1792 = vtanh.f32 %v1087_v2 }
 0x1a7   :  { %v966_v3 = vpop.f32.mrf.mxu2  ;;  %v979_v4 = vpop.f32.mrf.mxu3 }
 0x1a8   :  { %v1791_v5 = vpop.eup %1790 }
 0x1a9   :  { %v1102_v7 = vmul.f32 0.5, %v1791_v5 }
 0x1ab   :  { %v1109_v17 = vadd.f32 0.5, %v1102_v7 }
 0x1ac   :  { %v1042_v8 = vpop.f32.mrf.mxu0  ;;  %v1055_v9 = vpop.f32.mrf.mxu1 }
 0x1ad   :  { %v1793_v10 = vpop.eup %1792  ;;  %v1043_v11 = vadd.f32 %v1042_v8, %v318_v6 }
 0x1ae   :  { %v1101_v12 = vmul.f32 0.5, %v1793_v10 }
 0x1af   :  { %v1056_v14 = vadd.f32 %v1055_v9, %v1043_v11 }
 0x1b0   :  { %v1108_v18 = vadd.f32 0.5, %v1101_v12  ;;  %v1016_v20 = vpop.f32.mrf.mxu2  ;;  %v1029_v21 = vpop.f32.mrf.mxu3 }
 0x1b1   :  { %v1090_v19 = vmul.f32 0.5, %v1056_v14  ;;  %v1017_v23 = vadd.f32 %v1016_v20, %v317_v13 }
 0x1b2   :  { %v1114_v22 = vpack.c.bf16 %v1109_v17, %v1108_v18 }
 0x1b3   :  { %1794 = vtanh.f32 %v1090_v19  ;;  %v1030_v24 = vadd.f32 %v1029_v21, %v1017_v23 }
 0x1b4   :  { %1118 = vst [vmem:[#allocation2 + $0x8] sm:$0xff] %v1114_v22  ;;  %v1044_v25 = vpop.f32.mrf.mxu0  ;;  %v1057_v26 = vpop.f32.mrf.mxu1 }
 0x1b5   :  { %v1089_v27 = vmul.f32 0.5, %v1030_v24 }
 0x1b7   :  { %1796 = vtanh.f32 %v1089_v27 }
 0x1b8   :  { %v1018_v28 = vpop.f32.mrf.mxu2  ;;  %v1031_v29 = vpop.f32.mrf.mxu3 }
 0x1b9   :  { %v1795_v30 = vpop.eup %1794 }
 0x1ba   :  { %v1104_v32 = vmul.f32 0.5, %v1795_v30 }
 0x1bc   :  { %v1111_v35 = vadd.f32 0.5, %v1104_v32 }
 0x1bd   :  { %v1797_v33 = vpop.eup %1796 }
 0x1be   :  { %v1103_v34 = vmul.f32 0.5, %v1797_v33 }
 0x1c0   :  { %v1110_v36 = vadd.f32 0.5, %v1103_v34 }
 0x1c2   :  { %v1115_v37 = vpack.c.bf16 %v1111_v35, %v1110_v36 }
 0x1c4   :  { %1119 = vst [vmem:[#allocation2 + $0x10] sm:$0xff] %v1115_v37 }
 0x1d0   :  { %v1068_v39 = vpop.f32.mrf.mxu2  ;;  %v1081_v40 = vpop.f32.mrf.mxu3 }
 0x1d1   :  { %v1069_v41 = vadd.f32 %v1068_v39, %v319_v38 }
 0x1d3   :  { %v1082_v15 = vadd.f32 %v1081_v40, %v1069_v41 }
 0x1d5   :  { %v1091_v16 = vmul.f32 0.5, %v1082_v15 }
 0x1d7   :  { %1798 = vtanh.f32 %v1091_v16 }
 0x1d8   :  { %v1070_v42 = vpop.f32.mrf.mxu2  ;;  %v1083_v43 = vpop.f32.mrf.mxu3 }
 0x1dd   :  { %v1799_v44 = vpop.eup %1798 }
 0x1de   :  { %v1105_v45 = vmul.f32 0.5, %v1799_v44 }
 0x1e0   :  { %v1112_v46 = vadd.f32 0.5, %v1105_v45 }
 0x1e2   :  { %v1116_v47 = vpack.c.bf16 %v1112_v46, %v1112_v46 }
 0x1e4   :  { %1121 = vst.msk [vmem:[#allocation2 + $0x18] sm:$0xf] %vm1120_vm0, %v1116_v47 }
 0x1e5   :  { %1132 = dma.vmem_to_hbm [thread:$0]  %s1128_s6, 448, %s1130_s20, [#allocation3]  }
 0x1e6   :  { %1824 = dma.done.wait [#allocation3], 448  }
 0x1e7   :  { %1825 = vsyncadd [#allocation3], 4294966848 }
 0x1e8   :  { %1137 = vsyncpa [#allocation3], 1 }

</bundles_post_ra>
